<compile_context>
chip_gen: v5e
topology: v5e:2x2
jax: 0.10.0
libtpu: 0.0.40
codegen_flags: <defaults>
</compile_context>

<pallas_src>
import jax
import jax.numpy as jnp
from jax.experimental import pallas as pl
from jax.experimental.pallas import tpu as pltpu


def ffthead_kernel(x_ref, w1_ref, lb1_ref, w2_ref, lb2_ref, o_ref):
    # x tile: (TB, in_f) bf16. Weights bf16; biases / elementwise math in f32.
    # Linear(in_f, latent) with BN1 folded in.  bf16 MXU operands, f32 accumulate.
    h = jnp.dot(x_ref[...], w1_ref[...],
                preferred_element_type=jnp.float32) + lb1_ref[...]
    h = jnp.maximum(h, 0.0)                                   # ReLU (f32, VPU)

    # Classifier Linear(latent, out_f_padded) with BN2 folded in.
    z = jnp.dot(h.astype(jnp.bfloat16), w2_ref[...],
                preferred_element_type=jnp.float32) + lb2_ref[...]

    # Sigmoid: exp on EUP, approx reciprocal also on EUP (keeps the divide off the VALU).
    o_ref[...] = pl.reciprocal(1.0 + jnp.exp(-z), approx=True)


def _round_up(n, m):
    return ((n + m - 1) // m) * m


def ffthead_forward(x_nchw, params, *, batch_tile=None):
    B = x_nchw.shape[0]
    x2d = x_nchw.reshape(B, -1).astype(jnp.float32)           # nn.Flatten()
    in_f = x2d.shape[1]

    (g1, be1, m1, v1, w1, b1, g2, be2, m2, v2, w2, b2) = params
    eps = 1e-5

    # Fold eval-mode BatchNorm1d into the following Linear (pure algebra, f32):
    #   (x*s + bb) @ W + b  ==  x @ (s[:,None]*W) + (bb @ W + b)
    s1 = g1 / jnp.sqrt(v1 + eps)
    bb1 = be1 - m1 * s1
    s2 = g2 / jnp.sqrt(v2 + eps)
    bb2 = be2 - m2 * s2
    w1f = s1[:, None] * w1
    b1f = bb1 @ w1 + b1
    w2f = s2[:, None] * w2
    b2f = bb2 @ w2 + b2

    latent = w1.shape[1]
    out_f = w2.shape[1]

    # Lane-pad latent and output columns to multiples of 128 (lane-dense stores,
    # full MXU column width).  Sliced back to out_f after the call.
    L_pad = _round_up(latent, 128)
    N_pad = _round_up(out_f, 128)
    w1p = jnp.zeros((in_f, L_pad), jnp.float32).at[:, :latent].set(w1f)
    b1p = jnp.zeros((L_pad,), jnp.float32).at[:latent].set(b1f)
    w2p = jnp.zeros((L_pad, N_pad), jnp.float32).at[:latent, :out_f].set(w2f)
    b2p = jnp.zeros((N_pad,), jnp.float32).at[:out_f].set(b2f)

    # Batch tile: big enough to feed the MXU when B is large, minimal padding when small.
    if batch_tile is None:
        TB = min(256, max(8, _round_up(B, 8)))
    else:
        TB = batch_tile
    B_pad = _round_up(B, TB)

    # bf16 activations + weights for the MXU (halves x DMA traffic and weight footprint).
    x2d = x2d.astype(jnp.bfloat16)
    if B_pad != B:
        x2d = jnp.pad(x2d, ((0, B_pad - B), (0, 0)))
    grid = (B_pad // TB,)

    w1b = w1p.astype(jnp.bfloat16)
    w2b = w2p.astype(jnp.bfloat16)
    lb1 = b1p.reshape(1, L_pad).astype(jnp.float32)
    lb2 = b2p.reshape(1, N_pad).astype(jnp.float32)

    # Advisory cost estimate for XLA scheduling around the custom call.
    flops = int(2 * B_pad * (in_f * L_pad + L_pad * N_pad))
    bytes_accessed = int(x2d.size * 2 + w1b.size * 2 + w2b.size * 2
                         + lb1.size * 4 + lb2.size * 4 + B_pad * N_pad * 4)
    cost = pl.CostEstimate(flops=flops,
                           transcendentals=int(B_pad * N_pad),
                           bytes_accessed=bytes_accessed)

    # VMEM budget: resident weights + double-buffered x/out tiles + headroom.
    # Capped below v7x's 64 MiB physical VMEM.
    vmem_bytes = (2 * TB * in_f * 2
                  + w1b.size * 2 + w2b.size * 2
                  + lb1.size * 4 + lb2.size * 4
                  + 2 * TB * N_pad * 4
                  + (4 << 20))
    vmem_bytes = int(min(vmem_bytes, 60 * 1024 * 1024))

    out = pl.pallas_call(
        ffthead_kernel,
        out_shape=jax.ShapeDtypeStruct((B_pad, N_pad), jnp.float32),
        grid=grid,
        in_specs=[
            pl.BlockSpec((TB, in_f), lambda i: (i, 0)),        # x: batch-tiled, bf16
            pl.BlockSpec((in_f, L_pad), lambda i: (0, 0)),     # w1: resident (BN1 folded)
            pl.BlockSpec((1, L_pad), lambda i: (0, 0)),        # b1 (BN1 folded)
            pl.BlockSpec((L_pad, N_pad), lambda i: (0, 0)),    # w2: resident (BN2 folded)
            pl.BlockSpec((1, N_pad), lambda i: (0, 0)),        # b2 (BN2 folded)
        ],
        out_specs=pl.BlockSpec((TB, N_pad), lambda i: (i, 0)),
        compiler_params=pltpu.CompilerParams(
            dimension_semantics=("parallel",),
            vmem_limit_bytes=vmem_bytes),
        cost_estimate=cost,
    )(x2d, w1b, lb1, w2b, lb2)

    return out[:B, :out_f]


def make_params(key, in_f, latent_dim, out_f):
    ks = jax.random.split(key, 8)
    # BatchNorm1d(in_f): gamma, beta, running_mean, running_var
    g1 = 1.0 + 0.1 * jax.random.normal(ks[0], (in_f,), jnp.float32)
    be1 = 0.1 * jax.random.normal(ks[1], (in_f,), jnp.float32)
    m1 = 0.05 * jax.random.normal(ks[2], (in_f,), jnp.float32)
    v1 = jnp.abs(1.0 + 0.1 * jax.random.normal(ks[3], (in_f,), jnp.float32))
    # Linear(in_f, latent_dim) stored as (in, out)
    w1 = jax.random.normal(ks[4], (in_f, latent_dim), jnp.float32) / jnp.sqrt(in_f)
    b1 = 0.01 * jax.random.normal(ks[5], (latent_dim,), jnp.float32)
    # BatchNorm1d(latent_dim)
    g2 = jnp.ones((latent_dim,), jnp.float32)
    be2 = jnp.zeros((latent_dim,), jnp.float32)
    m2 = jnp.zeros((latent_dim,), jnp.float32)
    v2 = jnp.ones((latent_dim,), jnp.float32)
    # classifier Linear(latent_dim, out_f)
    w2 = jax.random.normal(ks[6], (latent_dim, out_f), jnp.float32) / jnp.sqrt(latent_dim)
    b2 = 0.01 * jax.random.normal(ks[7], (out_f,), jnp.float32)
    return (g1, be1, m1, v1, w1, b1, g2, be2, m2, v2, w2, b2)


if __name__ == "__main__":
    # Small shapes: x is NCHW (2, 4, 16, 16) -> in_f = 4*16*16 = 1024
    B, C, H, W = 2, 4, 16, 16
    in_f, latent_dim, out_f = C * H * W, 128, 8

    key = jax.random.PRNGKey(0)
    kx, kp = jax.random.split(key)
    x = jax.random.normal(kx, (B, C, H, W), jnp.float32)
    params = make_params(kp, in_f, latent_dim, out_f)

    out = ffthead_forward(x, params)
    jax.block_until_ready(out)

    # Pure-JAX f32 reference of the same eval-mode math (bf16 MXU operands in the
    # kernel -> loosened tolerance).
    (g1, be1, m1, v1, w1, b1, g2, be2, m2, v2, w2, b2) = params
    eps = 1e-5
    xr = x.reshape(B, -1)
    hr = (xr - m1) / jnp.sqrt(v1 + eps) * g1 + be1
    hr = jnp.maximum(hr @ w1 + b1, 0.0)
    hr = (hr - m2) / jnp.sqrt(v2 + eps) * g2 + be2
    ref = jax.nn.sigmoid(hr @ w2 + b2)
    assert out.shape == ref.shape, "shape mismatch vs reference"
    assert jnp.allclose(out, ref, atol=2.5e-2, rtol=2.5e-2), "mismatch vs reference"

    print("KERNEL_OK")
</pallas_src>

<mosaic_0001>
module attributes {stable_mosaic.version = 11 : i64} {
  func.func @ffthead_kernel(%arg0: i32, %arg1: memref<8x1024xbf16, #tpu.memory_space<vmem>>, %arg2: memref<1024x128xbf16, #tpu.memory_space<vmem>>, %arg3: memref<1x128xf32, #tpu.memory_space<vmem>>, %arg4: memref<128x128xbf16, #tpu.memory_space<vmem>>, %arg5: memref<1x128xf32, #tpu.memory_space<vmem>>, %arg6: memref<8x128xf32, #tpu.memory_space<vmem>>) attributes {dimension_semantics = [#tpu.dimension_semantics<parallel>], iteration_bounds = array<i64: 1>, scalar_prefetch = 0 : i64, scratch_operands = 0 : i64, tpu.core_type = #tpu.core_type<tc>, window_params = [{transform_indices = @transform_0, window_bounds = array<i64: 8, 1024>}, {pipeline_mode = #tpu.pipeline_mode<synchronous>, transform_indices = @transform_1, window_bounds = array<i64: 1024, 128>}, {pipeline_mode = #tpu.pipeline_mode<synchronous>, transform_indices = @transform_2, window_bounds = array<i64: 1, 128>}, {pipeline_mode = #tpu.pipeline_mode<synchronous>, transform_indices = @transform_3, window_bounds = array<i64: 128, 128>}, {pipeline_mode = #tpu.pipeline_mode<synchronous>, transform_indices = @transform_4, window_bounds = array<i64: 1, 128>}, {transform_indices = @transform_5, window_bounds = array<i64: 8, 128>}]} {
    %c0 = arith.constant 0 : index
    %c0_0 = arith.constant 0 : index
    %0 = vector.load %arg1[%c0, %c0_0] : memref<8x1024xbf16, #tpu.memory_space<vmem>>, vector<8x1024xbf16>
    %c0_1 = arith.constant 0 : index
    %c0_2 = arith.constant 0 : index
    %1 = vector.load %arg2[%c0_1, %c0_2] : memref<1024x128xbf16, #tpu.memory_space<vmem>>, vector<1024x128xbf16>
    %cst = arith.constant dense<0.000000e+00> : vector<8x128xf32>
    %2 = tpu.matmul %0, %1, %cst {dimension_numbers = #tpu.dot_dimension_numbers<[1], [0], [0], [1], [0, 0, 1, 1], [], []>} : vector<8x1024xbf16>, vector<1024x128xbf16>, vector<8x128xf32> -> vector<8x128xf32>
    %c0_3 = arith.constant 0 : index
    %c0_4 = arith.constant 0 : index
    %3 = vector.load %arg3[%c0_3, %c0_4] : memref<1x128xf32, #tpu.memory_space<vmem>>, vector<1x128xf32>
    %4 = vector.broadcast %3 : vector<1x128xf32> to vector<8x128xf32>
    %5 = arith.addf %2, %4 : vector<8x128xf32>
    %cst_5 = arith.constant 0.000000e+00 : f32
    %6 = vector.broadcast %cst_5 : f32 to vector<8x128xf32>
    %7 = arith.maximumf %5, %6 : vector<8x128xf32>
    %8 = arith.truncf %7 : vector<8x128xf32> to vector<8x128xbf16>
    %c0_6 = arith.constant 0 : index
    %c0_7 = arith.constant 0 : index
    %9 = vector.load %arg4[%c0_6, %c0_7] : memref<128x128xbf16, #tpu.memory_space<vmem>>, vector<128x128xbf16>
    %cst_8 = arith.constant dense<0.000000e+00> : vector<8x128xf32>
    %10 = tpu.matmul %8, %9, %cst_8 {dimension_numbers = #tpu.dot_dimension_numbers<[1], [0], [0], [1], [0, 0, 1, 1], [], []>} : vector<8x128xbf16>, vector<128x128xbf16>, vector<8x128xf32> -> vector<8x128xf32>
    %c0_9 = arith.constant 0 : index
    %c0_10 = arith.constant 0 : index
    %11 = vector.load %arg5[%c0_9, %c0_10] : memref<1x128xf32, #tpu.memory_space<vmem>>, vector<1x128xf32>
    %12 = vector.broadcast %11 : vector<1x128xf32> to vector<8x128xf32>
    %13 = arith.addf %10, %12 : vector<8x128xf32>
    %cst_11 = arith.constant 0.000000e+00 : f32
    %14 = vector.broadcast %cst_11 : f32 to vector<8x128xf32>
    %15 = arith.subf %14, %13 : vector<8x128xf32>
    %16 = math.exp %15 : vector<8x128xf32>
    %cst_12 = arith.constant 1.000000e+00 : f32
    %17 = vector.broadcast %cst_12 : f32 to vector<8x128xf32>
    %18 = arith.addf %17, %16 : vector<8x128xf32>
    %19 = tpu.reciprocal %18 {approx = true} : vector<8x128xf32> -> vector<8x128xf32>
    %c0_13 = arith.constant 0 : index
    %c0_14 = arith.constant 0 : index
    %20 = vector.load %arg6[%c0_13, %c0_14] : memref<8x128xf32, #tpu.memory_space<vmem>>, vector<8x128xf32>
    tpu.vector_store %arg6[%c0_13, %c0_14], %19 {strides = array<i32>} : memref<8x128xf32, #tpu.memory_space<vmem>>, vector<8x128xf32>,
    return
  }
  func.func @transform_0(%arg0: i32) -> (i32, i32) {
    %c0_i32 = arith.constant 0 : i32
    %c0_i32_0 = arith.constant 0 : i32
    return %arg0, %c0_i32 : i32, i32
  }
  func.func @transform_1(%arg0: i32) -> (i32, i32) {
    %c0_i32 = arith.constant 0 : i32
    %c0_i32_0 = arith.constant 0 : i32
    %c0_i32_1 = arith.constant 0 : i32
    return %c0_i32, %c0_i32_0 : i32, i32
  }
  func.func @transform_2(%arg0: i32) -> (i32, i32) {
    %c0_i32 = arith.constant 0 : i32
    %c0_i32_0 = arith.constant 0 : i32
    %c0_i32_1 = arith.constant 0 : i32
    return %c0_i32, %c0_i32_0 : i32, i32
  }
  func.func @transform_3(%arg0: i32) -> (i32, i32) {
    %c0_i32 = arith.constant 0 : i32
    %c0_i32_0 = arith.constant 0 : i32
    %c0_i32_1 = arith.constant 0 : i32
    return %c0_i32, %c0_i32_0 : i32, i32
  }
  func.func @transform_4(%arg0: i32) -> (i32, i32) {
    %c0_i32 = arith.constant 0 : i32
    %c0_i32_0 = arith.constant 0 : i32
    %c0_i32_1 = arith.constant 0 : i32
    return %c0_i32, %c0_i32_0 : i32, i32
  }
  func.func @transform_5(%arg0: i32) -> (i32, i32) {
    %c0_i32 = arith.constant 0 : i32
    %c0_i32_0 = arith.constant 0 : i32
    return %arg0, %c0_i32 : i32, i32
  }
}

</mosaic_0001>

<bundles_post_ra>
// kernel: tpu_custom_call.1
= control target key start
LH: loop header
LB: loop body
LE: loop exit
PB: predicated region body
PF: predicated region fallthrough
CT: control target
= control target key end

     0   :  { %10 = vsyncpa [#allocation3], 0  ;;  %s1353_s0 = inlined_call_operand.hbm [shape: bf16[8,1024], index: 0, kind: input, shape index: {}]   ;;  %s1354_s1 = inlined_call_operand.hbm [shape: bf16[1024,128], index: 1, kind: input, shape index: {}]   ;;  %s1355_s2 = inlined_call_operand.vmem [shape: f32[1,128], index: 2, kind: input, shape index: {}]   ;;  %s1356_s3 = inlined_call_operand.hbm [shape: bf16[128,128], index: 3, kind: input, shape index: {}]   ;;  %s1357_s4 = inlined_call_operand.vmem [shape: f32[1,128], index: 4, kind: input, shape index: {}]   ;;  %s1358_s5 = inlined_call_operand.hbm [shape: f32[8,128], index: 5, kind: output, shape index: {}]  }
   0x1   :  { %11 = vsyncpa [#allocation6], 0  ;;  %s28_s20 = sshll.u32 %s1354_s1, 4  ;;  %s29_s20 = int_to_ptr.hbm [resolvable:$true] %s28_s20 }
   0x2   :  { %12 = vsyncpa [#allocation4], 0  ;;  %s1299_s21 = smov [#allocation5]   ;;  %s18_s25 = sshll.u32 %s1353_s0, 4  ;;  %s19_s25 = int_to_ptr.hbm [resolvable:$true] %s18_s25 }
   0x3   :  { %s30_s22 = sshll.u32 %s1299_s21, 4  ;;  %s1300_s26 = smov 64   ;;  %s31_s22 = int_to_ptr.vmem [resolvable:$true] %s30_s22 }
   0x4   :  { %s1301_s27 = smov 4   ;;  %s1302_s28 = smov [#allocation2]  }
   0x5   :  { %36 = dma.hbm_to_vmem [thread:$0]  %s29_s20, 8192, %s31_s22, [#allocation6], %s1300_s26, %s1300_s26, %s1301_s27  }
   0x6   :  { %s20_s29 = sshll.u32 %s1302_s28, 4  ;;  %s43_s7 = sshll.u32 %s1356_s3, 4  ;;  %s21_s29 = int_to_ptr.vmem [resolvable:$true] %s20_s29  ;;  %s44_s7 = int_to_ptr.hbm [resolvable:$true] %s43_s7 }
   0x7   :  { %23 = dma.hbm_to_vmem [thread:$0]  %s19_s25, 512, %s21_s29, [#allocation3]  }
   0x8   :  { %s1303_s1 = smov [#allocation7]  }
   0x9   :  { %s45_s8 = sshll.u32 %s1303_s1, 4  ;;  %s46_s8 = int_to_ptr.vmem [resolvable:$true] %s45_s8 }
   0xa   :  { %51 = dma.hbm_to_vmem [thread:$0]  %s44_s7, 1024, %s46_s8, [#allocation6], %s1300_s26, %s1300_s26, %s1301_s27  }
   0xb   :  { %1293 = dma.done.wait [#allocation3], 512  }
   0xc   :  { %1294 = vsyncadd [#allocation3], 4294966784 }
   0xd   :  { %1295 = dma.done.wait [#allocation6], 9216  }
   0xe   :  { %1296 = vsyncadd [#allocation6], 4294958080  ;;  %v1120_v0 = vld [vmem:[#allocation5 + $0x38] sm:$0xff]  ;;  %v1119_v4 = vld [vmem:[#allocation5 + $0x30] sm:$0xff]  ;;  %s1304_s10 = smov [#allocation8]   ;;  %s814_s14 = sshll.u32 %s1358_s5, 4  ;;  %s815_s14 = int_to_ptr.hbm [resolvable:$true] %s814_s14 }
   0xf   :  { %v1128_v1 = vld [vmem:[#allocation5 + $0x78] sm:$0xff]  ;;  %614 = vmatpush.bf16.msra.mxu0 %v1120_v0  ;;  %v1127_v5 = vld [vmem:[#allocation5 + $0x70] sm:$0xff]  ;;  %v1118_v8 = vld [vmem:[#allocation5 + $0x28] sm:$0xff]  ;;  %s812_s11 = sshll.u32 %s1304_s10, 4  ;;  %s813_s11 = int_to_ptr.vmem [resolvable:$true] %s812_s11 }
  0x10   :  { %v1136_v2 = vld [vmem:[#allocation5 + $0xb8] sm:$0xff]  ;;  %627 = vmatpush.bf16.msra.mxu1 %v1128_v1  ;;  %v1135_v6 = vld [vmem:[#allocation5 + $0xb0] sm:$0xff]  ;;  %v1126_v9 = vld [vmem:[#allocation5 + $0x68] sm:$0xff] }
  0x11   :  { %v1144_v3 = vld [vmem:[#allocation5 + $0xf8] sm:$0xff]  ;;  %640 = vmatpush.bf16.msra.mxu2 %v1136_v2  ;;  %v1143_v7 = vld [vmem:[#allocation5 + $0xf0] sm:$0xff]  ;;  %v1134_v10 = vld [vmem:[#allocation5 + $0xa8] sm:$0xff] }
  0x12   :  { %653 = vmatpush.bf16.msra.mxu3 %v1144_v3  ;;  %v1142_v11 = vld [vmem:[#allocation5 + $0xe8] sm:$0xff]  ;;  %v1117_v12 = vld [vmem:[#allocation5 + $0x20] sm:$0xff]  ;;  %v1116_v16 = vld [vmem:[#allocation5 + $0x18] sm:$0xff] }
  0x13   :  { %615 = vmatpush.bf16.msra.mxu0 %v1119_v4  ;;  %v1125_v13 = vld [vmem:[#allocation5 + $0x60] sm:$0xff]  ;;  %v1124_v17 = vld [vmem:[#allocation5 + $0x58] sm:$0xff]  ;;  %v1115_v20 = vld [vmem:[#allocation5 + $0x10] sm:$0xff] }
  0x14   :  { %628 = vmatpush.bf16.msra.mxu1 %v1127_v5  ;;  %v1133_v14 = vld [vmem:[#allocation5 + $0xa0] sm:$0xff]  ;;  %v1132_v18 = vld [vmem:[#allocation5 + $0x98] sm:$0xff]  ;;  %v1123_v21 = vld [vmem:[#allocation5 + $0x50] sm:$0xff] }
  0x15   :  { %641 = vmatpush.bf16.msra.mxu2 %v1135_v6  ;;  %v1141_v15 = vld [vmem:[#allocation5 + $0xe0] sm:$0xff]  ;;  %v1140_v19 = vld [vmem:[#allocation5 + $0xd8] sm:$0xff]  ;;  %v1131_v22 = vld [vmem:[#allocation5 + $0x90] sm:$0xff] }
  0x16   :  { %654 = vmatpush.bf16.msra.mxu3 %v1143_v7  ;;  %v1139_v23 = vld [vmem:[#allocation5 + $0xd0] sm:$0xff]  ;;  %v1114_v24 = vld [vmem:[#allocation5 + $0x8] sm:$0xff]  ;;  %v66_v29 = vld [vmem:[#allocation2] sm:$0xff] }
  0x17   :  { %616 = vmatpush.bf16.msra.mxu0 %v1118_v8  ;;  %v1122_v25 = vld [vmem:[#allocation5 + $0x48] sm:$0xff]  ;;  %v1113_v30 = vld [vmem:[#allocation5] sm:$0xff]  ;;  %v206_v33 = vunpack.c.l.b16 %v66_v29  ;;  %v207_v37 = vunpack.c.h.b16 %v66_v29  ;;  %v1152_v38 = vld [vmem:[#allocation5 + $0x138] sm:$0xff] }
  0x18   :  { %629 = vmatpush.bf16.msra.mxu1 %v1126_v9  ;;  %v1130_v26 = vld [vmem:[#allocation5 + $0x88] sm:$0xff]  ;;  %v1121_v31 = vld [vmem:[#allocation5 + $0x40] sm:$0xff]  ;;  %v1160_v39 = vld [vmem:[#allocation5 + $0x178] sm:$0xff] }
  0x19   :  { %642 = vmatpush.bf16.msra.mxu2 %v1134_v10  ;;  %v1138_v27 = vld [vmem:[#allocation5 + $0xc8] sm:$0xff]  ;;  %v1129_v34 = vld [vmem:[#allocation5 + $0x80] sm:$0xff]  ;;  %v1168_v40 = vld [vmem:[#allocation5 + $0x1b8] sm:$0xff]  ;;  %v214_v43 = vpack.c.b16 %v206_v33, %v206_v33  ;;  %v215_v45 = vpack.c.b16 %v207_v37, %v207_v37 }
  0x1a   :  { %655 = vmatpush.bf16.msra.mxu3 %v1142_v11  ;;  %v67_v28 = vld [vmem:[#allocation2 + $0x8] sm:$0xff]  ;;  %v1137_v35 = vld [vmem:[#allocation5 + $0xc0] sm:$0xff]  ;;  %v1176_v41 = vld [vmem:[#allocation5 + $0x1f8] sm:$0xff] }
  0x1b   :  { %617 = vmatpush.bf16.msra.mxu0 %v1117_v12  ;;  %v208_v32 = vunpack.c.l.b16 %v67_v28  ;;  %v209_v36 = vunpack.c.h.b16 %v67_v28  ;;  %v1151_v46 = vld [vmem:[#allocation5 + $0x130] sm:$0xff]  ;;  %v1150_v50 = vld [vmem:[#allocation5 + $0x128] sm:$0xff]  ;;  %v1149_v54 = vld [vmem:[#allocation5 + $0x120] sm:$0xff] }
  0x1c   :  { %630 = vmatpush.bf16.msra.mxu1 %v1125_v13  ;;  %v1159_v47 = vld [vmem:[#allocation5 + $0x170] sm:$0xff]  ;;  %v1158_v51 = vld [vmem:[#allocation5 + $0x168] sm:$0xff]  ;;  %v1157_v55 = vld [vmem:[#allocation5 + $0x160] sm:$0xff] }
  0x1d   :  { %643 = vmatpush.bf16.msra.mxu2 %v1133_v14  ;;  %v216_v42 = vpack.c.b16 %v208_v32, %v208_v32  ;;  %v217_v44 = vpack.c.b16 %v209_v36, %v209_v36  ;;  %v1167_v48 = vld [vmem:[#allocation5 + $0x1b0] sm:$0xff]  ;;  %v1166_v52 = vld [vmem:[#allocation5 + $0x1a8] sm:$0xff]  ;;  %v1165_v56 = vld [vmem:[#allocation5 + $0x1a0] sm:$0xff] }
  0x1e   :  { %656 = vmatpush.bf16.msra.mxu3 %v1141_v15  ;;  %v1175_v49 = vld [vmem:[#allocation5 + $0x1f0] sm:$0xff]  ;;  %v1174_v53 = vld [vmem:[#allocation5 + $0x1e8] sm:$0xff]  ;;  %v1173_v57 = vld [vmem:[#allocation5 + $0x1e0] sm:$0xff] }
  0x1f   :  { %618 = vmatpush.bf16.msra.mxu0 %v1116_v16  ;;  %v1148_v58 = vld [vmem:[#allocation5 + $0x118] sm:$0xff]  ;;  %v1147_v62 = vld [vmem:[#allocation5 + $0x110] sm:$0xff]  ;;  %v1146_v2 = vld [vmem:[#allocation5 + $0x108] sm:$0xff] }
  0x20   :  { %631 = vmatpush.bf16.msra.mxu1 %v1124_v17  ;;  %v1156_v59 = vld [vmem:[#allocation5 + $0x158] sm:$0xff]  ;;  %v1155_v63 = vld [vmem:[#allocation5 + $0x150] sm:$0xff]  ;;  %v1154_v3 = vld [vmem:[#allocation5 + $0x148] sm:$0xff] }
  0x21   :  { %644 = vmatpush.bf16.msra.mxu2 %v1132_v18  ;;  %v1164_v60 = vld [vmem:[#allocation5 + $0x198] sm:$0xff]  ;;  %v1163_v0 = vld [vmem:[#allocation5 + $0x190] sm:$0xff]  ;;  %v1162_v5 = vld [vmem:[#allocation5 + $0x188] sm:$0xff] }
  0x22   :  { %657 = vmatpush.bf16.msra.mxu3 %v1140_v19  ;;  %v1172_v61 = vld [vmem:[#allocation5 + $0x1d8] sm:$0xff]  ;;  %v1171_v1 = vld [vmem:[#allocation5 + $0x1d0] sm:$0xff]  ;;  %v1170_v6 = vld [vmem:[#allocation5 + $0x1c8] sm:$0xff] }
  0x23   :  { %619 = vmatpush.bf16.msra.mxu0 %v1115_v20  ;;  %v68_v4 = vld [vmem:[#allocation2 + $0x10] sm:$0xff]  ;;  %v69_v7 = vld [vmem:[#allocation2 + $0x18] sm:$0xff]  ;;  %v1145_v10 = vld [vmem:[#allocation5 + $0x100] sm:$0xff] }
  0x24   :  { %632 = vmatpush.bf16.msra.mxu1 %v1123_v21  ;;  %v210_v8 = vunpack.c.l.b16 %v68_v4  ;;  %v211_v9 = vunpack.c.h.b16 %v68_v4  ;;  %v1153_v11 = vld [vmem:[#allocation5 + $0x140] sm:$0xff]  ;;  %v212_v12 = vunpack.c.l.b16 %v69_v7  ;;  %v213_v13 = vunpack.c.h.b16 %v69_v7  ;;  %v1184_v20 = vld [vmem:[#allocation7 + $0x38] sm:$0xff]  ;;  %v1183_v21 = vld [vmem:[#allocation7 + $0x30] sm:$0xff] }
  0x25   :  { %645 = vmatpush.bf16.msra.mxu2 %v1131_v22  ;;  %v1161_v14 = vld [vmem:[#allocation5 + $0x180] sm:$0xff]  ;;  %v1182_v22 = vld [vmem:[#allocation7 + $0x28] sm:$0xff] }
  0x26   :  { %658 = vmatpush.bf16.msra.mxu3 %v1139_v23  ;;  %v1169_v15 = vld [vmem:[#allocation5 + $0x1c0] sm:$0xff]  ;;  %v218_v16 = vpack.c.b16 %v210_v8, %v210_v8  ;;  %v219_v17 = vpack.c.b16 %v211_v9, %v211_v9  ;;  %v220_v18 = vpack.c.b16 %v212_v12, %v212_v12  ;;  %v221_v19 = vpack.c.b16 %v213_v13, %v213_v13  ;;  %v1178_v28 = vld [vmem:[#allocation7 + $0x8] sm:$0xff] }
  0x27   :  { %620 = vmatpush.bf16.msra.mxu0 %v1114_v24  ;;  %v1181_v23 = vld [vmem:[#allocation7 + $0x20] sm:$0xff]  ;;  %v1180_v24 = vld [vmem:[#allocation7 + $0x18] sm:$0xff] }
  0x28   :  { %633 = vmatpush.bf16.msra.mxu1 %v1122_v25  ;;  %v1177_v32 = vld [vmem:[#allocation7] sm:$0xff] }
  0x29   :  { %646 = vmatpush.bf16.msra.mxu2 %v1130_v26  ;;  %v1179_v26 = vld [vmem:[#allocation7 + $0x10] sm:$0xff] }
  0x2a   :  { %659 = vmatpush.bf16.msra.mxu3 %v1138_v27 }
  0x2b   :  { %621 = vmatpush.bf16.msra.mxu0 %v1113_v30 }
  0x2c   :  { %634 = vmatpush.bf16.msra.mxu1 %v1121_v31 }
  0x2d   :  { %647 = vmatpush.bf16.msra.mxu2 %v1129_v34  ;;  %v1191_v34 = vld [vmem:[%s1355_s2] ss:$0 sm:$0xff] }
  0x2e   :  { %660 = vmatpush.bf16.msra.mxu3 %v1137_v35  ;;  %622 = vmatmul.bf16.vlgmr.msra.gmra.mxu0 %v214_v43 }
  0x2f   :  { %666 = vmatpush.bf16.msrb.mxu0 %v1152_v38  ;;  %635 = vmatmul.bf16.vlgmr.msra.gmra.mxu1 %v215_v45 }
  0x30   :  { %679 = vmatpush.bf16.msrb.mxu1 %v1160_v39  ;;  %648 = vmatmul.bf16.vlgmr.msra.gmra.mxu2 %v216_v42 }
  0x31   :  { %692 = vmatpush.bf16.msrb.mxu2 %v1168_v40  ;;  %661 = vmatmul.bf16.vlgmr.msra.gmra.mxu3 %v217_v44 }
  0x32   :  { %705 = vmatpush.bf16.msrb.mxu3 %v1176_v41 }
  0x33   :  { %667 = vmatpush.bf16.msrb.mxu0 %v1151_v46 }
  0x34   :  { %680 = vmatpush.bf16.msrb.mxu1 %v1159_v47 }
  0x35   :  { %693 = vmatpush.bf16.msrb.mxu2 %v1167_v48 }
  0x36   :  { %706 = vmatpush.bf16.msrb.mxu3 %v1175_v49 }
  0x37   :  { %668 = vmatpush.bf16.msrb.mxu0 %v1150_v50 }
  0x38   :  { %681 = vmatpush.bf16.msrb.mxu1 %v1158_v51 }
  0x39   :  { %694 = vmatpush.bf16.msrb.mxu2 %v1166_v52 }
  0x3a   :  { %707 = vmatpush.bf16.msrb.mxu3 %v1174_v53 }
  0x3b   :  { %669 = vmatpush.bf16.msrb.mxu0 %v1149_v54 }
  0x3c   :  { %682 = vmatpush.bf16.msrb.mxu1 %v1157_v55  ;;  %v1192_v55 = vld [vmem:[%s1357_s4] ss:$0 sm:$0xff] }
  0x3d   :  { %695 = vmatpush.bf16.msrb.mxu2 %v1165_v56 }
  0x3e   :  { %708 = vmatpush.bf16.msrb.mxu3 %v1173_v57 }
  0x3f   :  { %670 = vmatpush.bf16.msrb.mxu0 %v1148_v58 }
  0x40   :  { %683 = vmatpush.bf16.msrb.mxu1 %v1156_v59 }
  0x41   :  { %696 = vmatpush.bf16.msrb.mxu2 %v1164_v60 }
  0x42   :  { %709 = vmatpush.bf16.msrb.mxu3 %v1172_v61 }
  0x43   :  { %671 = vmatpush.bf16.msrb.mxu0 %v1147_v62 }
  0x44   :  { %684 = vmatpush.bf16.msrb.mxu1 %v1155_v63 }
  0x45   :  { %697 = vmatpush.bf16.msrb.mxu2 %v1163_v0 }
  0x46   :  { %710 = vmatpush.bf16.msrb.mxu3 %v1171_v1 }
  0x47   :  { %672 = vmatpush.bf16.msrb.mxu0 %v1146_v2 }
  0x48   :  { %685 = vmatpush.bf16.msrb.mxu1 %v1154_v3 }
  0x49   :  { %698 = vmatpush.bf16.msrb.mxu2 %v1162_v5 }
  0x4a   :  { %711 = vmatpush.bf16.msrb.mxu3 %v1170_v6 }
  0x4b   :  { %673 = vmatpush.bf16.msrb.mxu0 %v1145_v10 }
  0x4c   :  { %686 = vmatpush.bf16.msrb.mxu1 %v1153_v11 }
  0x4d   :  { %699 = vmatpush.bf16.msrb.mxu2 %v1161_v14 }
  0x4e   :  { %712 = vmatpush.bf16.msrb.mxu3 %v1169_v15  ;;  %674 = vmatmul.bf16.vlgmr.msrb.gmra.mxu0 %v218_v16 }
  0x4f   :  { %687 = vmatmul.bf16.vlgmr.msrb.gmra.mxu1 %v219_v17  ;;  %788 = vmatpush.bf16.msra.mxu0 %v1184_v20 }
  0x50   :  { %700 = vmatmul.bf16.vlgmr.msrb.gmra.mxu2 %v220_v18 }
  0x51   :  { %713 = vmatmul.bf16.vlgmr.msrb.gmra.mxu3 %v221_v19 }
  0x53   :  { %789 = vmatpush.bf16.msra.mxu0 %v1183_v21 }
  0x57   :  { %790 = vmatpush.bf16.msra.mxu0 %v1182_v22 }
  0x5b   :  { %791 = vmatpush.bf16.msra.mxu0 %v1181_v23 }
  0x5f   :  { %792 = vmatpush.bf16.msra.mxu0 %v1180_v24 }
  0x63   :  { %793 = vmatpush.bf16.msra.mxu0 %v1179_v26 }
  0x67   :  { %794 = vmatpush.bf16.msra.mxu0 %v1178_v28 }
  0x6b   :  { %795 = vmatpush.bf16.msra.mxu0 %v1177_v32 }
  0xab   :  { %v623_v25 = vpop.f32.mrf.mxu0 }
  0xac   :  { %v636_v27 = vpop.f32.mrf.mxu1  ;;  %v624_v37 = vadd.f32 %v1191_v34, %v623_v25 }
  0xae   :  { %v637_v38 = vadd.f32 %v636_v27, %v624_v37 }
  0xb3   :  { %v649_v29 = vpop.f32.mrf.mxu2  ;;  %v625_v31 = vpop.f32.mrf.mxu0 }
  0xb4   :  { %v662_v30 = vpop.f32.mrf.mxu3  ;;  %v638_v33 = vpop.f32.mrf.mxu1  ;;  %v650_v39 = vadd.f32 %v649_v29, %v637_v38 }
  0xb6   :  { %v663_v40 = vadd.f32 %v662_v30, %v650_v39 }
  0xbb   :  { %v651_v35 = vpop.f32.mrf.mxu2 }
  0xbc   :  { %v664_v36 = vpop.f32.mrf.mxu3 }
  0xcb   :  { %v675_v41 = vpop.f32.mrf.mxu0 }
  0xcc   :  { %v688_v42 = vpop.f32.mrf.mxu1  ;;  %v676_v43 = vadd.f32 %v675_v41, %v663_v40 }
  0xce   :  { %v689_v44 = vadd.f32 %v688_v42, %v676_v43 }
  0xd3   :  { %v701_v45 = vpop.f32.mrf.mxu2  ;;  %v677_v48 = vpop.f32.mrf.mxu0 }
  0xd4   :  { %v714_v46 = vpop.f32.mrf.mxu3  ;;  %v702_v47 = vadd.f32 %v701_v45, %v689_v44  ;;  %v690_v49 = vpop.f32.mrf.mxu1 }
  0xd6   :  { %v715_v50 = vadd.f32 %v714_v46, %v702_v47 }
  0xd8   :  { %v718_v51 = vmax.f32 %v715_v50, 0.0 }
  0xda   :  { %v719_v52 = vpack.c.bf16 %v718_v51, %v718_v51 }
  0xdb   :  { %v703_v53 = vpop.f32.mrf.mxu2 }
  0xdc   :  { %v716_v54 = vpop.f32.mrf.mxu3  ;;  %796 = vmatmul.bf16.vlgmr.msra.gmra.mxu0 %v719_v52 }
 0x159   :  { %v797_v56 = vpop.f32.mrf.mxu0 }
 0x15a   :  { %v798_v57 = vadd.f32 %v1192_v55, %v797_v56 }
 0x15c   :  { %v801_v58 = vsub.f32 0.0, %v798_v57 }
 0x15e   :  { %v802_v59 = vmul.f32 1.442695, %v801_v58 }
 0x160   :  { %1193 = vpow2.f32 %v802_v59 }
 0x161   :  { %v799_v60 = vpop.f32.mrf.mxu0 }
 0x166   :  { %v1194_v61 = vpop.eup %1193 }
 0x167   :  { %v804_v62 = vadd.f32 1.0, %v1194_v61 }
 0x169   :  { %1195 = vrcp.f32 %v804_v62 }
 0x16f   :  { %v1196_v63 = vpop.eup %1195 }
 0x170   :  { %806 = vst [vmem:[#allocation8] sm:$0xff] %v1196_v63 }
 0x171   :  { %817 = dma.vmem_to_hbm [thread:$0]  %s813_s11, 128, %s815_s14, [#allocation4]  }
 0x172   :  { %1297 = dma.done.wait [#allocation4], 128  }
 0x173   :  { %1298 = vsyncadd [#allocation4], 4294967168 }
 0x174   :  { %822 = vsyncpa [#allocation3], 1 }
 0x175   :  { %823 = vsyncpa [#allocation6], 1 }
 0x176   :  { %824 = vsyncpa [#allocation4], 1 }

</bundles_post_ra>
